<compile_context>
chip_gen: v5e
topology: v5e:2x2
jax: 0.10.0
libtpu: 0.0.40
codegen_flags: <defaults>
</compile_context>

<pallas_src>
import jax
import jax.numpy as jnp
from jax.experimental import pallas as pl
from jax.experimental.pallas import tpu as pltpu

HIDDEN = 64      # dense1 output width
N2 = 15          # dense2_{neg,pos} output width (pass_samples=True)
N2C = 16         # width after cat with sum_logs
NEG_OFF = 0      # neg head occupies cols [0, 16)  of the intermediate
POS_OFF = 16     # pos head occupies cols [16, 32) of the intermediate
PAD = 128        # lane-dense padded width


def _round_up(n, m):
    return ((n + m - 1) // m) * m


def _reg_head_kernel(x_ref, sl_ref, w1_ref, w2_ref, w3_ref, b_ref, out_ref):
    # x_ref  : [TB, in_size]
    # sl_ref : [TB, 128]   (col 15 = neg_sum_logs, col 31 = pos_sum_logs, rest 0)
    # w1_ref : [in_size, 128]  w2_ref/w3_ref : [128, 128]
    # b_ref  : [3, 128]    (row 0 = b1, row 1 = b2 fused, row 2 = b3 fused)
    # out_ref: [TB, 128]   (col 0 = out3_neg, col 1 = out3_pos)
    x = x_ref[...]

    # dense1 + ReLU (padded hidden cols 64..127 stay exactly 0).
    # NOTE: out1.detach() (gates=True) only affects autograd; forward is unchanged.
    h = jnp.dot(x, w1_ref[...], preferred_element_type=jnp.float32)
    h = jnp.maximum(h + b_ref[0:1, :], 0.0)                       # [TB, 128]

    # fused dense2_neg / dense2_pos + ReLU.
    t = jnp.dot(h, w2_ref[...], preferred_element_type=jnp.float32)
    t = jnp.maximum(t + b_ref[1:2, :], 0.0)                       # [TB, 128]
    # torch.cat((out2_*, *_sum_logs), dim=1): sum_logs arrive pre-placed at cols 15/31.
    t = t + sl_ref[...]

    # fused dense3_neg / dense3_pos + sigmoid (gates=True).
    logits = jnp.dot(t, w3_ref[...], preferred_element_type=jnp.float32) + b_ref[2:3, :]
    out_ref[...] = (1.0 / (1.0 + jnp.exp(-logits))).astype(out_ref.dtype)


def regression_target_head(x, neg_sum_logs, pos_sum_logs, params, *, block_b=128):
    """Returns (out3_neg, out3_pos), each [B, 1], matching the PyTorch module order."""
    (w1, b1, w2n, b2n, w2p, b2p, w3n, b3n, w3p, b3p) = params
    B, in_size = x.shape
    f32 = jnp.float32

    # ---- one-time weight fusion / lane padding (plain XLA ops, outside the kernel) ----
    w1p = jnp.zeros((in_size, PAD), f32).at[:, :HIDDEN].set(w1)
    w2f = (jnp.zeros((PAD, PAD), f32)
           .at[:HIDDEN, NEG_OFF:NEG_OFF + N2].set(w2n)
           .at[:HIDDEN, POS_OFF:POS_OFF + N2].set(w2p))
    w3f = (jnp.zeros((PAD, PAD), f32)
           .at[NEG_OFF:NEG_OFF + N2C, 0].set(w3n[:, 0])
           .at[POS_OFF:POS_OFF + N2C, 1].set(w3p[:, 0]))
    b_stack = (jnp.zeros((3, PAD), f32)
               .at[0, :HIDDEN].set(b1[0])
               .at[1, NEG_OFF:NEG_OFF + N2].set(b2n[0])
               .at[1, POS_OFF:POS_OFF + N2].set(b2p[0])
               .at[2, 0].set(b3n[0, 0])
               .at[2, 1].set(b3p[0, 0]))

    # sum_logs placed lane-dense at their concat positions (cols 15 and 31).
    sl = (jnp.zeros((B, PAD), f32)
          .at[:, NEG_OFF + N2].set(neg_sum_logs[:, 0])
          .at[:, POS_OFF + N2].set(pos_sum_logs[:, 0]))

    # ---- batch tiling: rows padded to a multiple of the batch tile ----
    block_b = _round_up(max(block_b, 8), 8)
    tb = min(block_b, _round_up(B, 8))
    Bp = _round_up(B, tb)
    if Bp != B:
        x = jnp.pad(x, ((0, Bp - B), (0, 0)))
        sl = jnp.pad(sl, ((0, Bp - B), (0, 0)))
    grid = (Bp // tb,)

    out = pl.pallas_call(
        _reg_head_kernel,
        out_shape=jax.ShapeDtypeStruct((Bp, PAD), f32),
        grid=grid,
        in_specs=[
            pl.BlockSpec((tb, in_size), lambda i: (i, 0)),   # x tile (batch-strided)
            pl.BlockSpec((tb, PAD), lambda i: (i, 0)),       # sum_logs tile
            pl.BlockSpec((in_size, PAD), lambda i: (0, 0)),  # weights stay resident
            pl.BlockSpec((PAD, PAD), lambda i: (0, 0)),
            pl.BlockSpec((PAD, PAD), lambda i: (0, 0)),
            pl.BlockSpec((3, PAD), lambda i: (0, 0)),
        ],
        out_specs=pl.BlockSpec((tb, PAD), lambda i: (i, 0)),
        compiler_params=pltpu.CompilerParams(
            dimension_semantics=("parallel",)),
        cost_estimate=pl.CostEstimate(
            flops=2 * Bp * (in_size * PAD + PAD * PAD + PAD * PAD),
            transcendentals=Bp * PAD,
            bytes_accessed=4 * (Bp * in_size + 2 * Bp * PAD
                                + in_size * PAD + 2 * PAD * PAD + 3 * PAD)),
    )(x, sl, w1p, w2f, w3f, b_stack)

    # TODO(synk): for MXU-bound large batches on v6e/v7x, cast x / weights to bf16
    # (keep f32 accumulation); kept f32 here for exact parity with the reference.
    out3_neg = out[:B, 0:1]
    out3_pos = out[:B, 1:2]
    return out3_neg, out3_pos


def _init_params(key, in_size):
    """Deterministic synthetic parameters (torch.nn.Linear-ish uniform init),
    stored transposed: W [in, out], b [1, out]."""
    ks = jax.random.split(key, 10)

    def lin(kw, kb, fan_in, fan_out):
        bound = 1.0 / jnp.sqrt(fan_in)
        w = jax.random.uniform(kw, (fan_in, fan_out), jnp.float32, -bound, bound)
        b = jax.random.uniform(kb, (1, fan_out), jnp.float32, -bound, bound)
        return w, b

    w1, b1 = lin(ks[0], ks[1], in_size, HIDDEN)
    w2n, b2n = lin(ks[2], ks[3], HIDDEN, N2)
    w2p, b2p = lin(ks[4], ks[5], HIDDEN, N2)
    w3n, b3n = lin(ks[6], ks[7], N2C, 1)
    w3p, b3p = lin(ks[8], ks[9], N2C, 1)
    return (w1, b1, w2n, b2n, w2p, b2p, w3n, b3n, w3p, b3p)


if __name__ == "__main__":
    B, IN_SIZE = 8, 256  # module default in_size

    key = jax.random.PRNGKey(0)
    kx, kn, kp, kw = jax.random.split(key, 4)
    x = jax.random.normal(kx, (B, IN_SIZE), jnp.float32)
    neg_sum_logs = jax.random.normal(kn, (B, 1), jnp.float32)
    pos_sum_logs = jax.random.normal(kp, (B, 1), jnp.float32)
    params = _init_params(kw, IN_SIZE)

    out_neg, out_pos = regression_target_head(x, neg_sum_logs, pos_sum_logs, params)
    jax.block_until_ready((out_neg, out_pos))

    # Reference in plain JAX (same math as the PyTorch module, defaults config).
    (w1, b1, w2n, b2n, w2p, b2p, w3n, b3n, w3p, b3p) = params
    h_ref = jnp.maximum(x @ w1 + b1, 0.0)
    o2n = jnp.concatenate([jnp.maximum(h_ref @ w2n + b2n, 0.0), neg_sum_logs], axis=1)
    o2p = jnp.concatenate([jnp.maximum(h_ref @ w2p + b2p, 0.0), pos_sum_logs], axis=1)
    ref_neg = jax.nn.sigmoid(o2n @ w3n + b3n)
    ref_pos = jax.nn.sigmoid(o2p @ w3p + b3p)

    assert out_neg.shape == (B, 1) and out_pos.shape == (B, 1)
    assert jnp.allclose(out_neg, ref_neg, atol=1e-4, rtol=1e-4)
    assert jnp.allclose(out_pos, ref_pos, atol=1e-4, rtol=1e-4)

    print("KERNEL_OK")
</pallas_src>

<mosaic_0001>
module attributes {stable_mosaic.version = 11 : i64} {
  func.func @_reg_head_kernel(%arg0: i32, %arg1: memref<8x256xf32, #tpu.memory_space<vmem>>, %arg2: memref<8x128xf32, #tpu.memory_space<vmem>>, %arg3: memref<256x128xf32, #tpu.memory_space<vmem>>, %arg4: memref<128x128xf32, #tpu.memory_space<vmem>>, %arg5: memref<128x128xf32, #tpu.memory_space<vmem>>, %arg6: memref<3x128xf32, #tpu.memory_space<vmem>>, %arg7: memref<8x128xf32, #tpu.memory_space<vmem>>) attributes {dimension_semantics = [#tpu.dimension_semantics<parallel>], iteration_bounds = array<i64: 1>, scalar_prefetch = 0 : i64, scratch_operands = 0 : i64, tpu.core_type = #tpu.core_type<tc>, window_params = [{transform_indices = @transform_0, window_bounds = array<i64: 8, 256>}, {transform_indices = @transform_1, window_bounds = array<i64: 8, 128>}, {pipeline_mode = #tpu.pipeline_mode<synchronous>, transform_indices = @transform_2, window_bounds = array<i64: 256, 128>}, {pipeline_mode = #tpu.pipeline_mode<synchronous>, transform_indices = @transform_3, window_bounds = array<i64: 128, 128>}, {pipeline_mode = #tpu.pipeline_mode<synchronous>, transform_indices = @transform_4, window_bounds = array<i64: 128, 128>}, {pipeline_mode = #tpu.pipeline_mode<synchronous>, transform_indices = @transform_5, window_bounds = array<i64: 3, 128>}, {transform_indices = @transform_6, window_bounds = array<i64: 8, 128>}]} {
    %c0 = arith.constant 0 : index
    %c0_0 = arith.constant 0 : index
    %0 = vector.load %arg1[%c0, %c0_0] : memref<8x256xf32, #tpu.memory_space<vmem>>, vector<8x256xf32>
    %c0_1 = arith.constant 0 : index
    %c0_2 = arith.constant 0 : index
    %1 = vector.load %arg3[%c0_1, %c0_2] : memref<256x128xf32, #tpu.memory_space<vmem>>, vector<256x128xf32>
    %cst = arith.constant dense<0.000000e+00> : vector<8x128xf32>
    %2 = tpu.matmul %0, %1, %cst {dimension_numbers = #tpu.dot_dimension_numbers<[1], [0], [0], [1], [0, 0, 1, 1], [], []>} : vector<8x256xf32>, vector<256x128xf32>, vector<8x128xf32> -> vector<8x128xf32>
    %c0_3 = arith.constant 0 : index
    %c0_4 = arith.constant 0 : index
    %3 = vector.load %arg6[%c0_3, %c0_4] : memref<3x128xf32, #tpu.memory_space<vmem>>, vector<1x128xf32>
    %4 = vector.broadcast %3 : vector<1x128xf32> to vector<8x128xf32>
    %5 = arith.addf %2, %4 : vector<8x128xf32>
    %cst_5 = arith.constant 0.000000e+00 : f32
    %6 = vector.broadcast %cst_5 : f32 to vector<8x128xf32>
    %7 = arith.maximumf %5, %6 : vector<8x128xf32>
    %c0_6 = arith.constant 0 : index
    %c0_7 = arith.constant 0 : index
    %8 = vector.load %arg4[%c0_6, %c0_7] : memref<128x128xf32, #tpu.memory_space<vmem>>, vector<128x128xf32>
    %cst_8 = arith.constant dense<0.000000e+00> : vector<8x128xf32>
    %9 = tpu.matmul %7, %8, %cst_8 {dimension_numbers = #tpu.dot_dimension_numbers<[1], [0], [0], [1], [0, 0, 1, 1], [], []>} : vector<8x128xf32>, vector<128x128xf32>, vector<8x128xf32> -> vector<8x128xf32>
    %c1 = arith.constant 1 : index
    %c0_9 = arith.constant 0 : index
    %10 = vector.load %arg6[%c1, %c0_9] : memref<3x128xf32, #tpu.memory_space<vmem>>, vector<1x128xf32>
    %11 = vector.broadcast %10 : vector<1x128xf32> to vector<8x128xf32>
    %12 = arith.addf %9, %11 : vector<8x128xf32>
    %cst_10 = arith.constant 0.000000e+00 : f32
    %13 = vector.broadcast %cst_10 : f32 to vector<8x128xf32>
    %14 = arith.maximumf %12, %13 : vector<8x128xf32>
    %c0_11 = arith.constant 0 : index
    %c0_12 = arith.constant 0 : index
    %15 = vector.load %arg2[%c0_11, %c0_12] : memref<8x128xf32, #tpu.memory_space<vmem>>, vector<8x128xf32>
    %16 = arith.addf %14, %15 : vector<8x128xf32>
    %c0_13 = arith.constant 0 : index
    %c0_14 = arith.constant 0 : index
    %17 = vector.load %arg5[%c0_13, %c0_14] : memref<128x128xf32, #tpu.memory_space<vmem>>, vector<128x128xf32>
    %cst_15 = arith.constant dense<0.000000e+00> : vector<8x128xf32>
    %18 = tpu.matmul %16, %17, %cst_15 {dimension_numbers = #tpu.dot_dimension_numbers<[1], [0], [0], [1], [0, 0, 1, 1], [], []>} : vector<8x128xf32>, vector<128x128xf32>, vector<8x128xf32> -> vector<8x128xf32>
    %c2 = arith.constant 2 : index
    %c0_16 = arith.constant 0 : index
    %19 = vector.load %arg6[%c2, %c0_16] : memref<3x128xf32, #tpu.memory_space<vmem>>, vector<1x128xf32>
    %20 = vector.broadcast %19 : vector<1x128xf32> to vector<8x128xf32>
    %21 = arith.addf %18, %20 : vector<8x128xf32>
    %cst_17 = arith.constant 0.000000e+00 : f32
    %22 = vector.broadcast %cst_17 : f32 to vector<8x128xf32>
    %23 = arith.subf %22, %21 : vector<8x128xf32>
    %24 = math.exp %23 : vector<8x128xf32>
    %cst_18 = arith.constant 1.000000e+00 : f32
    %25 = vector.broadcast %cst_18 : f32 to vector<8x128xf32>
    %26 = arith.addf %25, %24 : vector<8x128xf32>
    %cst_19 = arith.constant 1.000000e+00 : f32
    %27 = vector.broadcast %cst_19 : f32 to vector<8x128xf32>
    %28 = arith.divf %27, %26 : vector<8x128xf32>
    %c0_20 = arith.constant 0 : index
    %c0_21 = arith.constant 0 : index
    %29 = vector.load %arg7[%c0_20, %c0_21] : memref<8x128xf32, #tpu.memory_space<vmem>>, vector<8x128xf32>
    tpu.vector_store %arg7[%c0_20, %c0_21], %28 {strides = array<i32>} : memref<8x128xf32, #tpu.memory_space<vmem>>, vector<8x128xf32>,
    return
  }
  func.func @transform_0(%arg0: i32) -> (i32, i32) {
    %c0_i32 = arith.constant 0 : i32
    %c0_i32_0 = arith.constant 0 : i32
    return %arg0, %c0_i32 : i32, i32
  }
  func.func @transform_1(%arg0: i32) -> (i32, i32) {
    %c0_i32 = arith.constant 0 : i32
    %c0_i32_0 = arith.constant 0 : i32
    return %arg0, %c0_i32 : i32, i32
  }
  func.func @transform_2(%arg0: i32) -> (i32, i32) {
    %c0_i32 = arith.constant 0 : i32
    %c0_i32_0 = arith.constant 0 : i32
    %c0_i32_1 = arith.constant 0 : i32
    return %c0_i32, %c0_i32_0 : i32, i32
  }
  func.func @transform_3(%arg0: i32) -> (i32, i32) {
    %c0_i32 = arith.constant 0 : i32
    %c0_i32_0 = arith.constant 0 : i32
    %c0_i32_1 = arith.constant 0 : i32
    return %c0_i32, %c0_i32_0 : i32, i32
  }
  func.func @transform_4(%arg0: i32) -> (i32, i32) {
    %c0_i32 = arith.constant 0 : i32
    %c0_i32_0 = arith.constant 0 : i32
    %c0_i32_1 = arith.constant 0 : i32
    return %c0_i32, %c0_i32_0 : i32, i32
  }
  func.func @transform_5(%arg0: i32) -> (i32, i32) {
    %c0_i32 = arith.constant 0 : i32
    %c0_i32_0 = arith.constant 0 : i32
    %c0_i32_1 = arith.constant 0 : i32
    return %c0_i32, %c0_i32_0 : i32, i32
  }
  func.func @transform_6(%arg0: i32) -> (i32, i32) {
    %c0_i32 = arith.constant 0 : i32
    %c0_i32_0 = arith.constant 0 : i32
    return %arg0, %c0_i32 : i32, i32
  }
}

</mosaic_0001>

<bundles_post_ra>
// kernel: tpu_custom_call.1
= control target key start
LH: loop header
LB: loop body
LE: loop exit
PB: predicated region body
PF: predicated region fallthrough
CT: control target
= control target key end

     0   :  { %11 = vsyncpa [#allocation3], 0  ;;  %s530_s0 = inlined_call_operand.hbm [shape: f32[8,256], index: 0, kind: input, shape index: {}]   ;;  %s531_s1 = inlined_call_operand.hbm [shape: f32[8,128], index: 1, kind: input, shape index: {}]   ;;  %s532_s2 = inlined_call_operand.hbm [shape: f32[256,128], index: 2, kind: input, shape index: {}]   ;;  %s533_s3 = inlined_call_operand.hbm [shape: f32[128,128], index: 3, kind: input, shape index: {}]   ;;  %s534_s4 = inlined_call_operand.hbm [shape: f32[128,128], index: 4, kind: input, shape index: {}]   ;;  %s535_s5 = inlined_call_operand.vmem [shape: f32[3,128], index: 5, kind: input, shape index: {}]   ;;  %s536_s6 = inlined_call_operand.hbm [shape: f32[8,128], index: 6, kind: output, shape index: {}]  }
   0x1   :  { %12 = vsyncpa [#allocation6], 0 }
   0x2   :  { %13 = vsyncpa [#allocation9], 0  ;;  %s31_s23 = sshll.u32 %s531_s1, 4  ;;  %s32_s23 = int_to_ptr.hbm [resolvable:$true] %s31_s23 }
   0x3   :  { %14 = vsyncpa [#allocation4], 0  ;;  %s460_s24 = smov [#allocation5]   ;;  %s54_s28 = sshll.u32 %s533_s3, 4  ;;  %s55_s28 = int_to_ptr.hbm [resolvable:$true] %s54_s28 }
   0x4   :  { %s33_s25 = sshll.u32 %s460_s24, 4  ;;  %s461_s29 = smov [#allocation8]   ;;  %s34_s25 = int_to_ptr.vmem [resolvable:$true] %s33_s25 }
   0x5   :  { %36 = dma.hbm_to_vmem [thread:$0]  %s32_s23, 128, %s34_s25, [#allocation6]  }
   0x6   :  { %s56_s30 = sshll.u32 %s461_s29, 4  ;;  %s20_s9 = sshll.u32 %s530_s0, 4  ;;  %s57_s30 = int_to_ptr.vmem [resolvable:$true] %s56_s30  ;;  %s21_s9 = int_to_ptr.hbm [resolvable:$true] %s20_s9 }
   0x7   :  { %s462_s1 = smov 128   ;;  %s463_s10 = smov 8  }
   0x8   :  { %62 = dma.hbm_to_vmem [thread:$0]  %s55_s28, 2048, %s57_s30, [#allocation9], %s462_s1, %s462_s1, %s463_s10  }
   0x9   :  { %s41_s13 = sshll.u32 %s532_s2, 4  ;;  %s464_s14 = smov [#allocation2]   ;;  %s42_s13 = int_to_ptr.hbm [resolvable:$true] %s41_s13 }
   0xa   :  { %s22_s15 = sshll.u32 %s464_s14, 4  ;;  %s465_s3 = smov [#allocation7]   ;;  %s23_s15 = int_to_ptr.vmem [resolvable:$true] %s22_s15 }
   0xb   :  { %25 = dma.hbm_to_vmem [thread:$0]  %s21_s9, 256, %s23_s15, [#allocation3]  }
   0xc   :  { %s43_s16 = sshll.u32 %s465_s3, 4  ;;  %s67_s0 = sshll.u32 %s534_s4, 4  ;;  %s44_s16 = int_to_ptr.vmem [resolvable:$true] %s43_s16  ;;  %s68_s0 = int_to_ptr.hbm [resolvable:$true] %s67_s0 }
   0xd   :  { %49 = dma.hbm_to_vmem [thread:$0]  %s42_s13, 4096, %s44_s16, [#allocation6], %s462_s1, %s462_s1, %s463_s10  }
   0xe   :  { %s466_s19 = smov [#allocation10]  }
   0xf   :  { %s69_s20 = sshll.u32 %s466_s19, 4  ;;  %s70_s20 = int_to_ptr.vmem [resolvable:$true] %s69_s20 }
  0x10   :  { %75 = dma.hbm_to_vmem [thread:$0]  %s68_s0, 2048, %s70_s20, [#allocation9], %s462_s1, %s462_s1, %s463_s10  }
  0x11   :  { %452 = dma.done.wait [#allocation3], 256  }
  0x12   :  { %453 = vsyncadd [#allocation3], 4294967040 }
  0x13   :  { %454 = dma.done.wait [#allocation6], 4224  }
  0x14   :  { %455 = vsyncadd [#allocation6], 4294963072 }
  0x15   :  { %456 = dma.done.wait [#allocation9], 4096  }
  0x16   :  { %457 = vsyncadd [#allocation9], 4294963200  ;;  %v115_v0 = vld [vmem:[#allocation7 + $0x78] sm:$0xff]  ;;  %v114_v1 = vld [vmem:[#allocation7 + $0x70] sm:$0xff]  ;;  %s467_s25 = smov [#allocation11]  }
  0x17   :  { %v131_v2 = vld [vmem:[#allocation7 + $0xf8] sm:$0xff]  ;;  %134 = vmatpush.msra.mxu0 %v115_v0  ;;  %v130_v3 = vld [vmem:[#allocation7 + $0xf0] sm:$0xff]  ;;  %v113_v4 = vld [vmem:[#allocation7 + $0x68] sm:$0xff]  ;;  %s279_s26 = sshll.u32 %s467_s25, 4  ;;  %s280_s26 = int_to_ptr.vmem [resolvable:$true] %s279_s26 }
  0x18   :  { %154 = vmatpush.msra.mxu1 %v131_v2  ;;  %v129_v5 = vld [vmem:[#allocation7 + $0xe8] sm:$0xff]  ;;  %v112_v6 = vld [vmem:[#allocation7 + $0x60] sm:$0xff]  ;;  %v111_v8 = vld [vmem:[#allocation7 + $0x58] sm:$0xff] }
  0x19   :  { %135 = vmatpush.msra.mxu0 %v114_v1  ;;  %v128_v7 = vld [vmem:[#allocation7 + $0xe0] sm:$0xff]  ;;  %v127_v9 = vld [vmem:[#allocation7 + $0xd8] sm:$0xff]  ;;  %v110_v10 = vld [vmem:[#allocation7 + $0x50] sm:$0xff] }
  0x1a   :  { %155 = vmatpush.msra.mxu1 %v130_v3  ;;  %v126_v11 = vld [vmem:[#allocation7 + $0xd0] sm:$0xff]  ;;  %v109_v12 = vld [vmem:[#allocation7 + $0x48] sm:$0xff]  ;;  %v190_v14 = vld [vmem:[#allocation8 + $0x78] sm:$0xff] }
  0x1b   :  { %136 = vmatpush.msra.mxu0 %v113_v4  ;;  %v125_v13 = vld [vmem:[#allocation7 + $0xc8] sm:$0xff]  ;;  %v189_v15 = vld [vmem:[#allocation8 + $0x70] sm:$0xff]  ;;  %v108_v16 = vld [vmem:[#allocation7 + $0x40] sm:$0xff]  ;;  %193 = vmatpush.msra.mxu2 %v190_v14 }
  0x1c   :  { %156 = vmatpush.msra.mxu1 %v129_v5  ;;  %v124_v17 = vld [vmem:[#allocation7 + $0xc0] sm:$0xff]  ;;  %v188_v18 = vld [vmem:[#allocation8 + $0x68] sm:$0xff]  ;;  %v107_v19 = vld [vmem:[#allocation7 + $0x38] sm:$0xff] }
  0x1d   :  { %137 = vmatpush.msra.mxu0 %v112_v6  ;;  %v123_v20 = vld [vmem:[#allocation7 + $0xb8] sm:$0xff]  ;;  %194 = vmatpush.msra.mxu2 %v189_v15  ;;  %v106_v21 = vld [vmem:[#allocation7 + $0x30] sm:$0xff]  ;;  %v187_v22 = vld [vmem:[#allocation8 + $0x60] sm:$0xff] }
  0x1e   :  { %157 = vmatpush.msra.mxu1 %v128_v7  ;;  %v122_v23 = vld [vmem:[#allocation7 + $0xb0] sm:$0xff]  ;;  %v186_v24 = vld [vmem:[#allocation8 + $0x58] sm:$0xff]  ;;  %v105_v25 = vld [vmem:[#allocation7 + $0x28] sm:$0xff] }
  0x1f   :  { %138 = vmatpush.msra.mxu0 %v111_v8  ;;  %195 = vmatpush.msra.mxu2 %v188_v18  ;;  %v121_v26 = vld [vmem:[#allocation7 + $0xa8] sm:$0xff]  ;;  %v185_v27 = vld [vmem:[#allocation8 + $0x50] sm:$0xff]  ;;  %v104_v28 = vld [vmem:[#allocation7 + $0x20] sm:$0xff] }
  0x20   :  { %158 = vmatpush.msra.mxu1 %v127_v9  ;;  %v120_v29 = vld [vmem:[#allocation7 + $0xa0] sm:$0xff]  ;;  %v184_v30 = vld [vmem:[#allocation8 + $0x48] sm:$0xff]  ;;  %v103_v31 = vld [vmem:[#allocation7 + $0x18] sm:$0xff] }
  0x21   :  { %139 = vmatpush.msra.mxu0 %v110_v10  ;;  %196 = vmatpush.msra.mxu2 %v187_v22  ;;  %v119_v32 = vld [vmem:[#allocation7 + $0x98] sm:$0xff]  ;;  %v183_v33 = vld [vmem:[#allocation8 + $0x40] sm:$0xff]  ;;  %v102_v34 = vld [vmem:[#allocation7 + $0x10] sm:$0xff] }
  0x22   :  { %159 = vmatpush.msra.mxu1 %v126_v11  ;;  %v118_v35 = vld [vmem:[#allocation7 + $0x90] sm:$0xff]  ;;  %v182_v36 = vld [vmem:[#allocation8 + $0x38] sm:$0xff]  ;;  %v101_v37 = vld [vmem:[#allocation7 + $0x8] sm:$0xff] }
  0x23   :  { %140 = vmatpush.msra.mxu0 %v109_v12  ;;  %197 = vmatpush.msra.mxu2 %v186_v24  ;;  %v117_v38 = vld [vmem:[#allocation7 + $0x88] sm:$0xff]  ;;  %v181_v39 = vld [vmem:[#allocation8 + $0x30] sm:$0xff]  ;;  %v100_v40 = vld [vmem:[#allocation7] sm:$0xff] }
  0x24   :  { %160 = vmatpush.msra.mxu1 %v125_v13  ;;  %v116_v41 = vld [vmem:[#allocation7 + $0x80] sm:$0xff]  ;;  %v98_v42 = vld [vmem:[#allocation2] sm:$0xff]  ;;  %v99_v43 = vld [vmem:[#allocation2 + $0x8] sm:$0xff] }
  0x25   :  { %141 = vmatpush.msra.mxu0 %v108_v16  ;;  %198 = vmatpush.msra.mxu2 %v185_v27  ;;  %v180_v44 = vld [vmem:[#allocation8 + $0x28] sm:$0xff]  ;;  %v179_v45 = vld [vmem:[#allocation8 + $0x20] sm:$0xff]  ;;  %v178_v46 = vld [vmem:[#allocation8 + $0x18] sm:$0xff] }
  0x26   :  { %161 = vmatpush.msra.mxu1 %v124_v17  ;;  %v177_v47 = vld [vmem:[#allocation8 + $0x10] sm:$0xff]  ;;  %v176_v48 = vld [vmem:[#allocation8 + $0x8] sm:$0xff]  ;;  %v175_v49 = vld [vmem:[#allocation8] sm:$0xff] }
  0x27   :  { %142 = vmatpush.msra.mxu0 %v107_v19  ;;  %199 = vmatpush.msra.mxu2 %v184_v30  ;;  %v231_v50 = vld [vmem:[#allocation10 + $0x78] sm:$0xff]  ;;  %v230_v51 = vld [vmem:[#allocation10 + $0x70] sm:$0xff]  ;;  %v229_v52 = vld [vmem:[#allocation10 + $0x68] sm:$0xff] }
  0x28   :  { %162 = vmatpush.msra.mxu1 %v123_v20  ;;  %234 = vmatpush.msra.mxu3 %v231_v50  ;;  %v228_v53 = vld [vmem:[#allocation10 + $0x60] sm:$0xff]  ;;  %v227_v54 = vld [vmem:[#allocation10 + $0x58] sm:$0xff]  ;;  %v226_v55 = vld [vmem:[#allocation10 + $0x50] sm:$0xff] }
  0x29   :  { %143 = vmatpush.msra.mxu0 %v106_v21  ;;  %200 = vmatpush.msra.mxu2 %v183_v33  ;;  %v225_v56 = vld [vmem:[#allocation10 + $0x48] sm:$0xff]  ;;  %v224_v57 = vld [vmem:[#allocation10 + $0x40] sm:$0xff]  ;;  %v223_v58 = vld [vmem:[#allocation10 + $0x38] sm:$0xff] }
  0x2a   :  { %163 = vmatpush.msra.mxu1 %v122_v23  ;;  %235 = vmatpush.msra.mxu3 %v230_v51  ;;  %v222_v59 = vld [vmem:[#allocation10 + $0x30] sm:$0xff]  ;;  %v221_v60 = vld [vmem:[#allocation10 + $0x28] sm:$0xff]  ;;  %v220_v61 = vld [vmem:[#allocation10 + $0x20] sm:$0xff] }
  0x2b   :  { %144 = vmatpush.msra.mxu0 %v105_v25  ;;  %201 = vmatpush.msra.mxu2 %v182_v36  ;;  %v301_v62 = vld [vmem:[%s535_s5] ss:$0 sm:$0xff]  ;;  %v219_v4 = vld [vmem:[#allocation10 + $0x18] sm:$0xff]  ;;  %v218_v5 = vld [vmem:[#allocation10 + $0x10] sm:$0xff] }
  0x2c   :  { %164 = vmatpush.msra.mxu1 %v121_v26  ;;  %236 = vmatpush.msra.mxu3 %v229_v52  ;;  %v217_v6 = vld [vmem:[#allocation10 + $0x8] sm:$0xff]  ;;  %v216_v7 = vld [vmem:[#allocation10] sm:$0xff]  ;;  %v214_v11 = vld [vmem:[#allocation5] sm:$0xff] }
  0x2d   :  { %145 = vmatpush.msra.mxu0 %v104_v28  ;;  %202 = vmatpush.msra.mxu2 %v181_v39  ;;  %v302_v8 = vld [vmem:[%s535_s5 + $0x1] ss:$0 sm:$0xff]  ;;  %v303_v14 = vld [vmem:[%s535_s5 + $0x2] ss:$0 sm:$0xff]  ;;  %s281_s5 = sshll.u32 %s536_s6, 4  ;;  %s282_s5 = int_to_ptr.hbm [resolvable:$true] %s281_s5 }
  0x2e   :  { %165 = vmatpush.msra.mxu1 %v120_v29  ;;  %237 = vmatpush.msra.mxu3 %v228_v53 }
  0x2f   :  { %146 = vmatpush.msra.mxu0 %v103_v31  ;;  %203 = vmatpush.msra.mxu2 %v180_v44 }
  0x30   :  { %166 = vmatpush.msra.mxu1 %v119_v32  ;;  %238 = vmatpush.msra.mxu3 %v227_v54 }
  0x31   :  { %147 = vmatpush.msra.mxu0 %v102_v34  ;;  %204 = vmatpush.msra.mxu2 %v179_v45 }
  0x32   :  { %167 = vmatpush.msra.mxu1 %v118_v35  ;;  %239 = vmatpush.msra.mxu3 %v226_v55 }
  0x33   :  { %148 = vmatpush.msra.mxu0 %v101_v37  ;;  %205 = vmatpush.msra.mxu2 %v178_v46 }
  0x34   :  { %168 = vmatpush.msra.mxu1 %v117_v38  ;;  %240 = vmatpush.msra.mxu3 %v225_v56 }
  0x35   :  { %149 = vmatpush.msra.mxu0 %v100_v40  ;;  %206 = vmatpush.msra.mxu2 %v177_v47 }
  0x36   :  { %169 = vmatpush.msra.mxu1 %v116_v41  ;;  %150 = vmatmul.f32.vlgmr.msra.gmra.mxu0 %v98_v42 }
  0x37   :  { %170 = vmatmul.f32.vlgmr.msra.gmra.mxu1 %v99_v43  ;;  %207 = vmatpush.msra.mxu2 %v176_v48 }
  0x38   :  { %241 = vmatpush.msra.mxu3 %v224_v57 }
  0x39   :  { %208 = vmatpush.msra.mxu2 %v175_v49 }
  0x3a   :  { %242 = vmatpush.msra.mxu3 %v223_v58 }
  0x3c   :  { %243 = vmatpush.msra.mxu3 %v222_v59 }
  0x3e   :  { %244 = vmatpush.msra.mxu3 %v221_v60 }
  0x40   :  { %245 = vmatpush.msra.mxu3 %v220_v61 }
  0x42   :  { %246 = vmatpush.msra.mxu3 %v219_v4 }
  0x44   :  { %247 = vmatpush.msra.mxu3 %v218_v5 }
  0x46   :  { %248 = vmatpush.msra.mxu3 %v217_v6 }
  0x48   :  { %249 = vmatpush.msra.mxu3 %v216_v7 }
  0xb3   :  { %v151_v63 = vpop.f32.mrf.mxu0 }
  0xb4   :  { %v171_v0 = vpop.f32.mrf.mxu1  ;;  %v152_v1 = vadd.f32 %v301_v62, %v151_v63 }
  0xb6   :  { %v172_v2 = vadd.f32 %v171_v0, %v152_v1 }
  0xb8   :  { %v174_v3 = vmax.f32 %v172_v2, 0.0 }
  0xba   :  { %209 = vmatmul.f32.vlgmr.msra.gmra.mxu2 %v174_v3 }
 0x13d   :  { %v210_v9 = vpop.f32.mrf.mxu2 }
 0x13e   :  { %v211_v10 = vadd.f32 %v302_v8, %v210_v9 }
 0x140   :  { %v213_v12 = vmax.f32 %v211_v10, 0.0 }
 0x142   :  { %v215_v13 = vadd.f32 %v214_v11, %v213_v12 }
 0x144   :  { %250 = vmatmul.f32.vlgmr.msra.gmra.mxu3 %v215_v13 }
 0x1c7   :  { %v251_v15 = vpop.f32.mrf.mxu3 }
 0x1c8   :  { %v252_v16 = vadd.f32 %v303_v14, %v251_v15 }
 0x1ca   :  { %v254_v17 = vsub.f32 0.0, %v252_v16 }
 0x1cc   :  { %v255_v18 = vmul.f32 1.442695, %v254_v17 }
 0x1ce   :  { %304 = vpow2.f32 %v255_v18 }
 0x1d4   :  { %v305_v19 = vpop.eup %304 }
 0x1d5   :  { %v257_v20 = vadd.f32 1.0, %v305_v19 }
 0x1d7   :  { %306 = vrcp.f32 %v257_v20  ;;  %v269_v24 = vand.u32 2147483648, %v257_v20  ;;  %v267_v26 = vand.u32 2147483647, %v257_v20  ;;  %vm263_vm1 = vweird.f32 %v257_v20 }
 0x1d9   :  { %v270_v28 = vor.u32 1.1754944e-38, %v269_v24  ;;  %vm268_vm3 = vcmp.eq.f32.partialorder %v267_v26, 8.507059e+37 }
 0x1dd   :  { %v307_v21 = vpop.eup %306 }
 0x1de   :  { %v259_v22 = vmul.f32 %v307_v21, %v257_v20  ;;  %vm264_vm0 = vweird.f32 %v307_v21 }
 0x1df   :  { %vm265_vm2 = vmor %vm263_vm1, %vm264_vm0 }
 0x1e0   :  { %v260_v23 = vsub.f32 1.0, %v259_v22 }
 0x1e2   :  { %v261_v25 = vmul.f32 %v307_v21, %v260_v23 }
 0x1e4   :  { %v262_v27 = vadd.f32 %v307_v21, %v261_v25 }
 0x1e6   :  { %v266_v29 = vsel %vm265_vm2, %v307_v21, %v262_v27 }
 0x1e7   :  { %v271_v30 = vsel %vm268_vm3, %v270_v28, %v266_v29 }
 0x1e8   :  { %273 = vst [vmem:[#allocation11] sm:$0xff] %v271_v30 }
 0x1e9   :  { %284 = dma.vmem_to_hbm [thread:$0]  %s280_s26, 128, %s282_s5, [#allocation4]  }
 0x1ea   :  { %458 = dma.done.wait [#allocation4], 128  }
 0x1eb   :  { %459 = vsyncadd [#allocation4], 4294967168 }
 0x1ec   :  { %289 = vsyncpa [#allocation3], 1 }
 0x1ed   :  { %290 = vsyncpa [#allocation6], 1 }
 0x1ee   :  { %291 = vsyncpa [#allocation9], 1 }
 0x1ef   :  { %292 = vsyncpa [#allocation4], 1 }

</bundles_post_ra>
